<compile_context>
chip_gen: v5e
topology: v5e:2x2
jax: 0.10.0
libtpu: 0.0.40
codegen_flags: <defaults>
</compile_context>

<pallas_src>
import jax
import jax.numpy as jnp
import numpy as np
from jax import lax
from jax.experimental import pallas as pl
from jax.experimental.pallas import tpu as pltpu


def _sublane(itemsize):
    # 8 rows for 32-bit dtypes, 16 for 16-bit, 32 for 8-bit (packed sublanes).
    return max(8, 32 // max(int(itemsize), 1))


def _round_down_multiple(x, m):
    return max(m, (x // m) * m)


def _vmem_capacity_bytes():
    try:
        cap = int(pltpu.get_tpu_info().vmem_capacity_bytes)
        if cap > 0:
            return cap
    except Exception:
        pass
    return 64 * 1024 * 1024  # conservative fallback: v7x per-TensorCore VMEM


def _vmem_budgets():
    cap = _vmem_capacity_bytes()
    # Scoped VMEM limit: 3/4 of physical, capped at 64 MiB (v5e/v6e -> 64 MiB,
    # v7x -> 48 MiB).  Per-pipeline-stage budget keeps the double-buffered
    # working set at <= half of that limit.
    vmem_limit = min((cap * 3) // 4, 64 * 1024 * 1024)
    stage_budget = min(vmem_limit // 4, 16 * 1024 * 1024)
    return vmem_limit, stage_budget


def _choose_tile_h(H, W, n_parts, itemsize, sublane, stage_budget):
    # Bytes handled per row per grid step: n_parts inputs + 2*n_parts outputs.
    bytes_per_row = 3 * n_parts * W * itemsize
    tile_h = max(sublane, stage_budget // max(bytes_per_row, 1))
    tile_h = _round_down_multiple(min(tile_h, 1024), sublane)
    # Keep >= ~4 grid steps so the "parallel" axis can shard across v7x's two
    # TensorCores and the in/out DMA streams overlap; the extra per-step cost
    # (~0.35 us) is negligible on single-core chips.
    if H >= 2 * sublane:
        cap = _round_down_multiple(pl.cdiv(H, 4), sublane)
        tile_h = min(tile_h, cap)
    if tile_h >= H:
        return H  # single tile; block equals the full dim
    return tile_h


def _make_nabla2d_kernel(*, H, tile_h, scale0, scale1, n_parts):
    """Build a kernel computing forward differences along both axes.

    Per input plane p (1 plane for real input, 2 for the fused complex path)
    the kernel gets (x_ref, halo_ref); then per plane one output ref:
        x_ref    : VMEM (tile_h, W)   current row-tile
        halo_ref : VMEM (halo_h, W)   rows starting at the next tile's first row
        o_ref    : VMEM (2, tile_h, W)
            o_ref[0] = forward difference along rows    (dim 0)
            o_ref[1] = forward difference along columns (dim 1)
    Scales are trace-time Python constants (1.0 -> multiply skipped).
    """

    def _diffs(x_ref, halo_ref, o_ref):
        x = x_ref[...]
        th, w = x.shape  # static (tile_h, W)

        # ---- forward difference along dim 0 (rows / sublanes) -------------
        riota = lax.broadcasted_iota(jnp.int32, (th, 1), 0)
        grow = pl.program_id(0) * tile_h + riota          # global row index
        if th > 1:
            # x_up[r] = x[(r + 1) % th]  (XLU sublane rotate, no VMEM copy).
            x_up = pltpu.roll(x, shift=th - 1, axis=0)
            # Replace the wrapped last row with the next tile's first row.
            x_dn = jnp.where(riota == th - 1, halo_ref[0:1, :], x_up)
        else:
            x_dn = halo_ref[0:1, :]
        # Replicate-pad semantics: the global last row's difference is 0; this
        # also neutralizes the padding rows of a partial last tile.
        dh = jnp.where(grow >= H - 1, 0.0, x_dn - x)

        # ---- forward difference along dim 1 (columns / lanes) -------------
        if w > 1:
            # x_rt[:, c] = x[:, (c + 1) % w]  (XLU lane rotate).
            x_rt = pltpu.roll(x, shift=w - 1, axis=1)
            ciota = lax.broadcasted_iota(jnp.int32, (th, w), 1)
            dw = jnp.where(ciota >= w - 1, 0.0, x_rt - x)
        else:
            dw = jnp.zeros_like(x)

        if scale0 != 1.0:
            dh = dh * scale0
        if scale1 != 1.0:
            dw = dw * scale1

        o_ref[0, :, :] = dh.astype(o_ref.dtype)
        o_ref[1, :, :] = dw.astype(o_ref.dtype)

    def kernel(*refs):
        in_refs = refs[: 2 * n_parts]
        out_refs = refs[2 * n_parts:]
        for p in range(n_parts):
            _diffs(in_refs[2 * p], in_refs[2 * p + 1], out_refs[p])

    return kernel


def _nabla2d_pallas(parts, scale, H, W, tile_h=None):
    """parts: tuple of one or two real (H, W) arrays sharing a dtype."""
    n_parts = len(parts)
    dtype = parts[0].dtype
    itemsize = jnp.dtype(dtype).itemsize
    sublane = _sublane(itemsize)
    vmem_limit, stage_budget = _vmem_budgets()

    if tile_h is None:
        tile_h = _choose_tile_h(H, W, n_parts, itemsize, sublane, stage_budget)
    else:
        tile_h = int(tile_h)
        assert tile_h == H or (0 < tile_h < H and tile_h % sublane == 0), (
            "tile_h must equal H or be a positive multiple of the sublane "
            f"granularity ({sublane}) smaller than H")

    num_tiles = pl.cdiv(H, tile_h)
    halo_h = min(sublane, H)
    # halo-height blocks per row tile (exact whenever the halo actually
    # matters, i.e. for full non-last tiles; a don't-care otherwise).
    bpt = max(tile_h // halo_h, 1)
    last_halo_block = pl.cdiv(H, halo_h) - 1

    def x_map(i):
        return (i, 0)

    def halo_map(i):
        # First rows of the next tile; clamped in-bounds for the last tile
        # (where its value is never used thanks to the in-kernel row mask).
        return (jnp.minimum((i + 1) * bpt, last_halo_block), 0)

    def out_map(i):
        return (0, i, 0)

    in_specs = []
    for _ in range(n_parts):
        in_specs.append(pl.BlockSpec((tile_h, W), x_map))
        in_specs.append(pl.BlockSpec((halo_h, W), halo_map))
    out_specs = [pl.BlockSpec((2, tile_h, W), out_map) for _ in range(n_parts)]
    out_shape = [jax.ShapeDtypeStruct((2, H, W), dtype) for _ in range(n_parts)]

    kernel = _make_nabla2d_kernel(
        H=H, tile_h=tile_h,
        scale0=float(scale[0]), scale1=float(scale[1]),
        n_parts=n_parts)

    cost = pl.CostEstimate(
        flops=2 * n_parts * H * W,
        transcendentals=0,
        bytes_accessed=(3 * H * W + num_tiles * halo_h * W) * n_parts * itemsize)

    out = pl.pallas_call(
        kernel,
        grid=(num_tiles,),
        in_specs=in_specs,
        out_specs=out_specs,
        out_shape=out_shape,
        compiler_params=pltpu.CompilerParams(
            dimension_semantics=("parallel",),
            vmem_limit_bytes=int(vmem_limit)),
        cost_estimate=cost,
    )(*[a for p in parts for a in (p, p)])
    return tuple(out)


class NablaPallas:
    """JAX/Pallas port of medutils.optimization_th.nabla_th.Nabla (2-D inputs)."""

    def __init__(self, mode="2d", beta=None):
        self.mode = mode
        self.beta = beta

    def _scale(self):
        # scale[0] multiplies the dim-0 difference, scale[1] the dim-1 one.
        if self.mode in ("1d", "2d", "3d", "4d"):
            return (1.0, 1.0)
        elif self.mode in ("1dt", "2dt", "3dt"):
            assert isinstance(self.beta, tuple) and len(self.beta) == 2
            mu1, mu2 = self.beta
            return (float(mu2), float(mu1))  # dx[0]*=mu2, dx[1:]*=mu1
        else:
            raise NotImplementedError(f"Nabla for mode {self.mode} not defined!")

    def __call__(self, x, *, tile_h=None):
        # TODO(synk): only the 2-D spatial case of the torch module is
        # implemented here; 1-D / 3-D inputs would need their own tiling.
        assert x.ndim == 2, "This Pallas Nabla kernel implements the 2-D case."
        H, W = x.shape
        scale = self._scale()
        if jnp.iscomplexobj(x):
            # One fused pallas_call for both planes: a single software pipeline
            # overlaps both DMA streams and halves launch overhead.
            out_re, out_im = _nabla2d_pallas(
                (jnp.real(x), jnp.imag(x)), scale, H, W, tile_h=tile_h)
            return lax.complex(out_re, out_im)
        (out,) = _nabla2d_pallas((x,), scale, H, W, tile_h=tile_h)
        return out

    @property
    def L(self):
        if self.mode == "1d":
            return 2.0
        elif self.mode == "2d":
            return float(np.sqrt(8))
        elif self.mode == "3d":
            return float(np.sqrt(12))
        elif self.mode == "4d":
            return 4.0
        elif self.mode == "1dt":
            return float(np.sqrt(4 * (1 * self.beta[0] ** 2 + 1 * self.beta[1] ** 2)))
        elif self.mode == "2dt":
            return float(np.sqrt(4 * (2 * self.beta[0] ** 2 + 1 * self.beta[1] ** 2)))
        elif self.mode == "3dt":
            return float(np.sqrt(4 * (3 * self.beta[0] ** 2 + 1 * self.beta[1] ** 2)))
        else:
            raise ValueError(f"Lipschitz constant L for mode {self.mode} not defined")


def _nabla_ref(x, mode="2d", beta=None):
    """Pure-JAX reference mirroring the torch semantics (2-D inputs)."""
    d0 = jnp.zeros_like(x).at[:-1, :].set(x[1:, :] - x[:-1, :])
    d1 = jnp.zeros_like(x).at[:, :-1].set(x[:, 1:] - x[:, :-1])
    dx = jnp.stack([d0, d1])
    if mode in ("1dt", "2dt", "3dt"):
        mu1, mu2 = beta
        dx = dx.at[0].multiply(mu2).at[1].multiply(mu1)
    return dx


if __name__ == "__main__":
    key = jax.random.PRNGKey(0)
    k1, k2 = jax.random.split(key)

    # --- test 1: small real input, mode '2d' (auto tiling -> multi-tile) ----
    H, W = 16, 16
    x = jax.random.normal(key, (H, W), dtype=jnp.float32)
    nab = NablaPallas(mode="2d")
    out = jax.block_until_ready(nab(x))
    assert out.shape == (2, H, W), out.shape
    assert out.dtype == x.dtype, out.dtype
    np.testing.assert_allclose(np.asarray(out), np.asarray(_nabla_ref(x)),
                               atol=1e-6, rtol=1e-6)

    # --- test 2: multi-tile grid with partial last tile, '1dt' scaling ------
    H2, W2 = 40, 128
    x2 = jax.random.normal(k1, (H2, W2), dtype=jnp.float32)
    nab_t = NablaPallas(mode="1dt", beta=(0.5, 2.0))
    out2 = jax.block_until_ready(nab_t(x2, tile_h=16))
    ref2 = _nabla_ref(x2, mode="1dt", beta=(0.5, 2.0))
    np.testing.assert_allclose(np.asarray(out2), np.asarray(ref2),
                               atol=1e-5, rtol=1e-5)

    # --- test 3: lane-dense input (W = 256) with automatic tile selection ---
    H3, W3 = 64, 256
    x3 = jax.random.normal(k2, (H3, W3), dtype=jnp.float32)
    out3 = jax.block_until_ready(nab(x3))
    np.testing.assert_allclose(np.asarray(out3), np.asarray(_nabla_ref(x3)),
                               atol=1e-6, rtol=1e-6)

    # --- test 4: complex input through the single fused pallas_call ---------
    xc = (jax.random.normal(k1, (H2, W2), dtype=jnp.float32)
          + 1j * jax.random.normal(k2, (H2, W2), dtype=jnp.float32)
          ).astype(jnp.complex64)
    nab_c = NablaPallas(mode="2dt", beta=(0.7, 1.3))
    outc = jax.block_until_ready(nab_c(xc, tile_h=16))
    refc = _nabla_ref(xc, mode="2dt", beta=(0.7, 1.3))
    assert outc.dtype == jnp.complex64, outc.dtype
    np.testing.assert_allclose(np.asarray(outc), np.asarray(refc),
                               atol=1e-5, rtol=1e-5)

    print("KERNEL_OK")
</pallas_src>

<mosaic_0001>
module attributes {stable_mosaic.version = 11 : i64} {
  func.func @kernel(%arg0: i32, %arg1: memref<8x16xf32, #tpu.memory_space<vmem>>, %arg2: memref<8x16xf32, #tpu.memory_space<vmem>>, %arg3: memref<2x8x16xf32, #tpu.memory_space<vmem>>) attributes {dimension_semantics = [#tpu.dimension_semantics<parallel>], iteration_bounds = array<i64: 2>, scalar_prefetch = 0 : i64, scratch_operands = 0 : i64, tpu.core_type = #tpu.core_type<tc>, window_params = [{transform_indices = @transform_0, window_bounds = array<i64: 8, 16>}, {transform_indices = @transform_1, window_bounds = array<i64: 8, 16>}, {transform_indices = @transform_2, window_bounds = array<i64: 2, 8, 16>}]} {
    %c0 = arith.constant 0 : index
    %c0_0 = arith.constant 0 : index
    %0 = vector.load %arg1[%c0, %c0_0] : memref<8x16xf32, #tpu.memory_space<vmem>>, vector<8x16xf32>
    %1 = tpu.iota {dimensions = array<i32: 0>} : vector<8x1xi32>
    %c8_i32 = arith.constant 8 : i32
    %2 = arith.muli %arg0, %c8_i32 : i32
    %3 = vector.broadcast %2 : i32 to vector<8x1xi32>
    %4 = arith.addi %3, %1 : vector<8x1xi32>
    %c7_i32 = arith.constant 7 : i32
    %5 = tpu.dynamic_rotate %0 by %c7_i32 dim 0 : vector<8x16xf32>, i32 -> vector<8x16xf32>
    %c7_i32_1 = arith.constant 7 : i32
    %6 = vector.broadcast %c7_i32_1 : i32 to vector<8x1xi32>
    %7 = arith.cmpi eq, %1, %6 : vector<8x1xi32>
    %c0_2 = arith.constant 0 : index
    %c0_3 = arith.constant 0 : index
    %8 = vector.load %arg2[%c0_2, %c0_3] : memref<8x16xf32, #tpu.memory_space<vmem>>, vector<1x16xf32>
    %9 = vector.shape_cast %7 : vector<8x1xi1> to vector<8x1xi1>
    %10 = vector.broadcast %9 : vector<8x1xi1> to vector<8x16xi1>
    %11 = vector.shape_cast %8 : vector<1x16xf32> to vector<1x16xf32>
    %12 = vector.broadcast %11 : vector<1x16xf32> to vector<8x16xf32>
    %13 = arith.select %10, %12, %5 : vector<8x16xi1>, vector<8x16xf32>
    %c15_i32 = arith.constant 15 : i32
    %14 = vector.broadcast %c15_i32 : i32 to vector<8x1xi32>
    %15 = arith.cmpi sge, %4, %14 : vector<8x1xi32>
    %16 = arith.subf %13, %0 : vector<8x16xf32>
    %cst = arith.constant 0.000000e+00 : f32
    %17 = vector.shape_cast %15 : vector<8x1xi1> to vector<8x1xi1>
    %18 = vector.broadcast %17 : vector<8x1xi1> to vector<8x16xi1>
    %19 = vector.broadcast %cst : f32 to vector<8x16xf32>
    %20 = arith.select %18, %19, %16 : vector<8x16xi1>, vector<8x16xf32>
    %c15_i32_4 = arith.constant 15 : i32
    %21 = tpu.dynamic_rotate %0 by %c15_i32_4 dim 1 : vector<8x16xf32>, i32 -> vector<8x16xf32>
    %22 = tpu.iota {dimensions = array<i32: 1>} : vector<8x16xi32>
    %c15_i32_5 = arith.constant 15 : i32
    %23 = vector.broadcast %c15_i32_5 : i32 to vector<8x16xi32>
    %24 = arith.cmpi sge, %22, %23 : vector<8x16xi32>
    %25 = arith.subf %21, %0 : vector<8x16xf32>
    %cst_6 = arith.constant 0.000000e+00 : f32
    %26 = vector.broadcast %cst_6 : f32 to vector<8x16xf32>
    %27 = arith.select %24, %26, %25 : vector<8x16xi1>, vector<8x16xf32>
    %c0_7 = arith.constant 0 : index
    %c0_8 = arith.constant 0 : index
    %c0_9 = arith.constant 0 : index
    %28 = vector.load %arg3[%c0_7, %c0_8, %c0_9] : memref<2x8x16xf32, #tpu.memory_space<vmem>>, vector<1x8x16xf32>
    %29 = vector.shape_cast %28 : vector<1x8x16xf32> to vector<8x16xf32>
    %30 = vector.shape_cast %20 : vector<8x16xf32> to vector<1x8x16xf32>
    tpu.vector_store %arg3[%c0_7, %c0_8, %c0_9], %30 {strides = array<i32>} : memref<2x8x16xf32, #tpu.memory_space<vmem>>, vector<1x8x16xf32>,
    %c1 = arith.constant 1 : index
    %c0_10 = arith.constant 0 : index
    %c0_11 = arith.constant 0 : index
    %31 = vector.load %arg3[%c1, %c0_10, %c0_11] : memref<2x8x16xf32, #tpu.memory_space<vmem>>, vector<1x8x16xf32>
    %32 = vector.shape_cast %31 : vector<1x8x16xf32> to vector<8x16xf32>
    %33 = vector.shape_cast %27 : vector<8x16xf32> to vector<1x8x16xf32>
    tpu.vector_store %arg3[%c1, %c0_10, %c0_11], %33 {strides = array<i32>} : memref<2x8x16xf32, #tpu.memory_space<vmem>>, vector<1x8x16xf32>,
    return
  }
  func.func @transform_0(%arg0: i32) -> (i32, i32) {
    %c0_i32 = arith.constant 0 : i32
    %c0_i32_0 = arith.constant 0 : i32
    return %arg0, %c0_i32 : i32, i32
  }
  func.func @transform_1(%arg0: i32) -> (i32, i32) {
    %c1_i32 = arith.constant 1 : i32
    %0 = arith.addi %arg0, %c1_i32 : i32
    %c1_i32_0 = arith.constant 1 : i32
    %1 = arith.muli %0, %c1_i32_0 : i32
    %c1_i32_1 = arith.constant 1 : i32
    %2 = arith.minsi %1, %c1_i32_1 : i32
    %c0_i32 = arith.constant 0 : i32
    %c0_i32_2 = arith.constant 0 : i32
    return %2, %c0_i32 : i32, i32
  }
  func.func @transform_2(%arg0: i32) -> (i32, i32, i32) {
    %c0_i32 = arith.constant 0 : i32
    %c0_i32_0 = arith.constant 0 : i32
    %c0_i32_1 = arith.constant 0 : i32
    return %c0_i32, %arg0, %c0_i32_0 : i32, i32, i32
  }
}

</mosaic_0001>

<bundles_post_ra>
// kernel: tpu_custom_call.1
= control target key start
LH: loop header
LB: loop body
LE: loop exit
PB: predicated region body
PF: predicated region fallthrough
CT: control target
= control target key end

     0   :  { %s857_s0 = inlined_call_operand.hbm [shape: f32[16,16], index: 0, kind: input, shape index: {}]   ;;  %s858_s1 = inlined_call_operand.hbm [shape: f32[16,16], index: 1, kind: input, shape index: {}]   ;;  %s859_s2 = inlined_call_operand.hbm [shape: f32[2,16,16], index: 2, kind: output, shape index: {}]  }
   0x1   :  { %863 = sst [smem:[#allocation12_spill]] %s857_s0 }
   0x2   :  { %7 = vsyncpa [#allocation3], 0 }
   0x3   :  { %9 = vsyncpa [#allocation3 + $0x1], 0 }
   0x4   :  { %10 = vsyncpa [#allocation6], 0 }
   0x5   :  { %12 = vsyncpa [#allocation6 + $0x1], 0 }
   0x6   :  { %13 = vsyncpa [#allocation4], 0 }
   0x7   :  { %15 = vsyncpa [#allocation4 + $0x1], 0  ;;  %s641_s9 = smov 0   ;;  %s643_s10 = smov 0  }
   0x8   :  { %s645_s11 = smov 0   ;;  %s647_s12 = smov 0  }
   0x9   :  { %s649_s13 = smov 0   ;;  %s651_s14 = smov 0  }
   0xa   :  { %s653_s15 = smov 0  }
   0xb LB: > { %s677_s16 = sadd.s32 4294967295, %s618_s15   ;;  %s365_s17 = sadd.s32 4294967294, %s618_s15   ;;  %s618_s15 = sphi %s653_s15, %s886_s15   ;;  %s614_s14 = sphi %s651_s14, %s885_s14   ;;  %s610_s13 = sphi %s649_s13, %s884_s13   ;;  %s606_s12 = sphi %s647_s12, %s883_s12   ;;  %s602_s11 = sphi %s645_s11, %s882_s11   ;;  %s598_s10 = sphi %s643_s10, %s881_s10   ;;  %s594_s9 = sphi %s641_s9, %s880_s9  }
   0xc   : > { %s28_s18 = sadd.s32 1, %s614_s14  ;;  %p35_p0 = scmp.ne.s32.totalorder %s614_s14, %s610_s13 }
   0xd   : > { %p862_p1 = scmp.eq.s32.totalorder %s618_s15, 0  ;;  %p41_p2 = scmp.ne.s32.totalorder %s610_s13, %s606_s12 }
   0xe   : > { %p861_p3 = scmp.eq.s32.totalorder %s677_s16, 0  ;;  %p97_p4 = scmp.eq.s32.totalorder %s677_s16, 1 }
   0xf   : > { %p690_p5 = por %p862_p1, %p35_p0  ;;  %p103_p6 = scmp.eq.s32.totalorder %s365_s17, 1 }
  0x10   : > { %p696_p7 = por %p861_p3, %p41_p2  ;;  %p700_p8 = por %p97_p4, %p35_p0 }
  0x11   : > { %p704_p9 = por %p103_p6, %p41_p2  ;;  %p860_p11 = scmp.lt.s32.totalorder %s618_s15, 2 }
  0x12   : > { %s123_s23 = sand.u32 1, %s614_s14   ;;  %s369_s25 = sshll.u32 %s618_s15, 3 }
  0x13   : > { %s368_s24 = sshll.u32 %s123_s23, 3  ;;  %s868_s0 = sld [smem:[#allocation12_spill]] }
  0x14   : > { %s127_s29 = scalar_lea.vmem [#allocation2], %s368_s24  ;;  %p719_p12 = pnand %p860_p11, %p690_p5 }
  0x15   : > { %s135_s30 = sshll.u32 %s127_s29, 4  ;;  %p372_p13 = scmp.ge.s32.totalorder %s618_s15, 1  ;;  %s136_s30 = int_to_ptr.vmem [resolvable:$true] %s135_s30 }
  0x16   : > { %p162_p0 = scmp.lt.s32.totalorder %s618_s15, 3  ;;  %s124_s5 = scalar_lea.sflag [#allocation3], %s123_s23 }
  0x17   : > { %p468_p4 = pneg %p719_p12 }
  0x19   : > { %s131_s28 = scalar_lea.hbm %s868_s0, %s369_s25  ;;  %s471_s19 = scalar_lea.hbm %s868_s0, 16 }
  0x1a   : > { %s133_s3 = sshll.u32 %s131_s28, 4  ;;  %s134_s3 = int_to_ptr.hbm [resolvable:$true] %s133_s3 }
  0x1b   : > { %s464_s6 = sshra.s32 %s134_s3, 4  ;;  %s465_s6 = int_to_ptr.hbm [resolvable:$true] %s464_s6 }
  0x1c   : > { %s466_s7 = scalar_lea.hbm %s465_s6, 8  ;;  %p472_p5 = scmp.lt.s32.totalorder %s465_s6, %s868_s0 }
  0x1d   : > { %p467_p2 = scmp.ne.s32.totalorder %s465_s6, %s466_s7  ;;  %p473_p11 = scmp.lt.s32.totalorder %s471_s19, %s466_s7 }
  0x1f   : > { %p469_p6 = pnand %p468_p4, %p467_p2  ;;  %p474_p3 = por %p473_p11, %p472_p5 }
  0x21   : > { %p470_p10 = pneg %p469_p6 }
  0x23   : > { %p475_p1 = pnand %p474_p3, %p470_p10 }
  0x25   : > { %478 = shalt.err (!%p475_p1)
}
  0x26   : > { %391 = dma.hbm_to_vmem [thread:$0]  (!%p719_p12), %s134_s3, 128, %s136_s30, %s124_s5  }
  0x27   : > { %p739_p1 = pnand %p372_p13, %p162_p0  ;;  %s744_s26 = sadd.s32 1, %s618_s15  }
  0x28   : > { %s60_s27 = sadd.s32 1, %s602_s11  ;;  %s25_s28 = ssub.s32 %s618_s15, %s744_s26 }
  0x29   : > { %p52_p3 = scmp.lt.s32.totalorder %s744_s26, 1  ;;  %p26_p10 = scmp.eq.s32.totalorder %s25_s28, 0 }
  0x2a   : > { %s54_s29 = sadd.s32 1, %s744_s26  ;;  %p67_p12 = scmp.ne.s32.totalorder %s602_s11, %s598_s10 }
  0x2b   : > { %s53_s30 = scalar_select %p52_p3, %s744_s26, 1 }
  0x2c   : > { %s755_s3 = scalar_select %p26_p10, %s614_s14, %s28_s18  }
  0x2d   : > { %p55_p11 = scmp.lt.s32.totalorder %s54_s29, 1  ;;  %p73_p13 = scmp.ne.s32.totalorder %s598_s10, %s594_s9 }
  0x2e   : > { %871 = sst [smem:[#allocation11_spill]] %s755_s3  ;;  %s142_s4 = sand.u32 1, %s602_s11  }
  0x2f   : > { %s888_s29 = smov (!%p55_p11, %s54_s29), 1  ;;  %p872_p0 = scmp.eq.s32.totalorder %s618_s15, 0 }
  0x30   : > { %p874_p4 = scmp.eq.s32.totalorder %s677_s16, 0  ;;  %s57_s7 = ssub.s32 %s53_s30, %s888_s29 }
  0x31   : > { %p764_p2 = por %p67_p12, %p872_p0  ;;  %p58_p5 = scmp.eq.s32.totalorder %s57_s7, 0 }
  0x32   : > { %p770_p6 = por %p73_p13, %p874_p4  ;;  %s370_s18 = sshll.u32 %s142_s4, 3 }
  0x33   : > { %s371_s8 = sshll.u32 %s53_s30, 3  ;;  %s146_s25 = scalar_lea.vmem [#allocation5], %s370_s18 }
  0x34   : > { %s775_s17 = scalar_select %p58_p5, %s602_s11, %s60_s27  }
  0x35   : > { %s153_s24 = scalar_lea.hbm %s858_s1, %s371_s8  ;;  %s157_s28 = sshll.u32 %s146_s25, 4  ;;  %s158_s28 = int_to_ptr.vmem [resolvable:$true] %s157_s28 }
  0x36   : > { %s155_s0 = sshll.u32 %s153_s24, 4  ;;  %p876_p3 = scmp.lt.s32.totalorder %s618_s15, 2  ;;  %s156_s0 = int_to_ptr.hbm [resolvable:$true] %s155_s0 }
  0x37   : > { %s143_s29 = scalar_lea.sflag [#allocation6], %s142_s4  ;;  %s494_s30 = sshra.s32 %s156_s0, 4  ;;  %s495_s30 = int_to_ptr.hbm [resolvable:$true] %s494_s30 }
  0x38   : > { %p784_p10 = pnand %p876_p3, %p764_p2  ;;  %s496_s27 = scalar_lea.hbm %s495_s30, 8 }
  0x39   : > { %p497_p11 = scmp.ne.s32.totalorder %s495_s30, %s496_s27  ;;  %s501_s8 = scalar_lea.hbm %s858_s1, 16 }
  0x3a   : > { %p498_p12 = pneg %p784_p10  ;;  %p502_p2 = scmp.lt.s32.totalorder %s495_s30, %s858_s1 }
  0x3b   : > { %p503_p4 = scmp.lt.s32.totalorder %s501_s8, %s496_s27 }
  0x3c   : > { %p499_p13 = pnand %p498_p12, %p497_p11 }
  0x3d   : > { %p504_p5 = por %p503_p4, %p502_p2 }
  0x3e   : > { %p500_p0 = pneg %p499_p13 }
  0x40   : > { %p505_p3 = pnand %p504_p5, %p500_p0 }
  0x42   : > { %508 = shalt.err (!%p505_p3)
}
  0x43   : > { %394 = dma.hbm_to_vmem [thread:$0]  (!%p784_p10), %s156_s0, 128, %s158_s28, %s143_s29  }
  0x44   : > { %166 = sbr.rel (%p739_p1) target bundleno = 434 (0x1b2), region = 28  ;;  %s801_s4 = sand.u32 (!%p739_p1), 1, %s610_s13  }
  0x45   : > { %s373_s19 = sshll.u32 (!%p739_p1), %s801_s4, 3  ;;  %s169_s24 = scalar_lea.sflag (!%p739_p1), [#allocation3], %s801_s4 }
  0x46   : > { %s172_s25 = scalar_lea.vmem (!%p739_p1), [#allocation2], %s373_s19 }
  0x49   : > { %581 = dma.done.wait (%p696_p7), %s169_s24, 128  }
  0x4a   : > { %583 = vsyncadd (%p696_p7), %s169_s24, 4294967168  ;;  %s178_s0 = sand.u32 1, %s598_s10  }
  0x4b   : > { %s374_s3 = sshll.u32 %s178_s0, 3  ;;  %s179_s23 = scalar_lea.sflag [#allocation6], %s178_s0 }
  0x4c   : > { %s182_s28 = scalar_lea.vmem [#allocation5], %s374_s3 }
  0x4d   : > { %585 = dma.done.wait (%p770_p6), %s179_s23, 128  }
  0x4e   : > { %587 = vsyncadd (%p770_p6), %s179_s23, 4294967168  ;;  %v212_v0 = vld [vmem:[%s172_s25] sm:$0xff]  ;;  %s620_s29 = smov 16   ;;  %s621_s30 = smov 1   ;;  %vm230_vm0 = vcmask 1047680   ;;  %v213_v7 = vlaneseq  ;;  %vm250_vm3 = vcmask 130048  }
  0x4f   : > { %231 = vrot.lane.b32.xlu0 %v212_v0, %s620_s29  ;;  %241 = vrot.lane.b32.xlu1 %v212_v0, %s621_s30  ;;  %s622_s20 = smov 127   ;;  %s376_s6 = sshll.u32 %s677_s16, 3  ;;  %v463_v11 = vld [vmem:[%s182_s28] ss:$0 sm:$0xff]  ;;  %v218_v12 = vrot.slane %v212_v0, 1 }
  0x50   : > { %v214_v8 = vshrl.u32 %v213_v7, 7  ;;  %v216_v9 = vstv %s376_s6  ;;  %s375_s27 = sshll.u32 %s801_s4, 4  ;;  %s265_s16 = scalar_lea.hbm %s859_s2, %s376_s6  ;;  %v238_v16 = vand.u32 127, %v213_v7 }
  0x51   : > { %s208_s7 = scalar_lea.vmem [#allocation7], %s375_s27  ;;  %s268_s9 = sshll.u32 %s265_s16, 4  ;;  %s269_s9 = int_to_ptr.hbm [resolvable:$true] %s268_s9 }
  0x52   : > { %v217_v10 = vadd.s32 %v216_v9, %v214_v8  ;;  %vm219_vm1 = vcmp.eq.s32.totalorder %v214_v8, 7  ;;  %s266_s5 = sshll.u32 %s208_s7, 4  ;;  %vm239_vm4 = vcmp.ge.s32.totalorder %v238_v16, 15  ;;  %s255_s19 = scalar_lea.sflag [#allocation4], %s801_s4  ;;  %s267_s5 = int_to_ptr.vmem [resolvable:$true] %s266_s5 }
  0x53   : > { %v224_v13 = vsel %vm219_vm1, %v463_v11, %v218_v12  ;;  %s538_s24 = sshra.s32 %s269_s9, 4  ;;  %s544_s23 = scalar_lea.hbm %s859_s2, 32  ;;  %s539_s24 = int_to_ptr.hbm [resolvable:$true] %s538_s24 }
  0x54   : > { %vm225_vm2 = vcmp.ge.s32.totalorder %v217_v10, 15  ;;  %v226_v14 = vsub.f32 %v224_v13, %v212_v0  ;;  %s540_s25 = scalar_lea.hbm %s539_s24, 16  ;;  %p545_p10 = scmp.lt.s32.totalorder %s539_s24, %s859_s2 }
  0x55   : > { %p541_p7 = scmp.ne.s32.totalorder %s539_s24, %s540_s25  ;;  %p546_p11 = scmp.lt.s32.totalorder %s544_s23, %s540_s25 }
  0x56   : > { %v229_v15 = vsel %vm225_vm2, 0.0, %v226_v14 }
  0x57   : > { %251 = vst.msk [vmem:[%s208_s7] sm:$0xff] %vm250_vm3, %v229_v15  ;;  %p542_p1 = pnand %p541_p7, %p700_p8  ;;  %p547_p12 = por %p546_p11, %p545_p10 }
  0x59   : > { %p543_p6 = pneg %p542_p1 }
  0x5b   : > { %p548_p13 = pnand %p547_p12, %p543_p6 }
  0xc1   : > { %v232_v1 = vpop.permute.xlu0 %231  ;;  %v242_v3 = vpop.permute.xlu1 %241 }
  0xc2   : > { %v233_v2 = vsel %vm230_vm0, %v232_v1, %v212_v0 }
  0xc3   : > { %234 = vrot.lane.b32.xlu0 %v233_v2, %s620_s29 }
 0x135   : > { %v235_v4 = vpop.permute.xlu0 %234 }
 0x136   : > { %v236_v5 = vsel %vm230_vm0, %v235_v4, %v212_v0 }
 0x137   : > { %v244_v6 = vsub.f32 %v236_v5, %v242_v3 }
 0x139   : > { %246 = vrot.lane.b32.xlu1 %v244_v6, %s622_s20 }
 0x1ab   : > { %v247_v17 = vpop.permute.xlu1 %246 }
 0x1ac   : > { %v249_v18 = vsel %vm239_vm4, 0.0, %v247_v17 }
 0x1ad   : > { %377 = vst.msk [vmem:[%s208_s7 + $0x8] sm:$0xff] %vm250_vm3, %v249_v18 }
 0x1ae   : > { %551 = shalt.err (!%p548_p13)
}
 0x1af   : > { %s623_s4 = smov 128   ;;  %s624_s30 = smov 256  }
 0x1b0   : > { %s625_s20 = smov 8  }
 0x1b1   : > { %386 = dma.vmem_to_hbm [thread:$0]  (%p700_p8), %s267_s5, 256, %s269_s9, %s255_s19, %s623_s4, %s624_s30, %s625_s20  }
 0x1b2 PF: > { %s283_s6 = sand.u32 1, %s606_s12   ;;  %p878_p0 = scmp.ge.s32.totalorder %s618_s15, 2 }
 0x1b3   : > { %s284_s27 = scalar_lea.sflag [#allocation4], %s283_s6 }
 0x1b4   : > { %p396_p2 = pnand %p878_p0, %p704_p9 }
 0x1b6   : > { %p397_p4 = pneg %p396_p2 }
 0x1b8   : > { %589 = dma.done.wait (%p397_p4), %s284_s27, 256  }
 0x1b9   : > { %591 = vsyncadd (%p397_p4), %s284_s27, 4294967040  ;;  %s879_s21 = sld [smem:[#allocation11_spill]]  ;;  %p18_p8 = scmp.ge.s32.totalorder %s744_s26, 4  }
 0x1ba   : > { %s880_s9 = smov %s598_s10  ;;  %s881_s10 = smov %s602_s11 }
 0x1bb   : > { %s882_s11 = smov %s775_s17  ;;  %s883_s12 = smov %s610_s13 }
 0x1bc   : > { %s884_s13 = smov %s614_s14  ;;  %s886_s15 = smov %s744_s26 }
 0x1bd   :  { %20 = sbr.rel (!%p18_p8) target bundleno = 11 (0xb), region = 87 }
 0x1bf   : > { %s885_s14 = smov %s879_s21 }
 0x1c2   :  { %290 = vsyncpa [#allocation3], 1 }
 0x1c3   :  { %292 = vsyncpa [#allocation3 + $0x1], 1 }
 0x1c4   :  { %293 = vsyncpa [#allocation6], 1 }
 0x1c5   :  { %295 = vsyncpa [#allocation6 + $0x1], 1 }
 0x1c6   :  { %296 = vsyncpa [#allocation4], 1 }
 0x1c7   :  { %298 = vsyncpa [#allocation4 + $0x1], 1 }

</bundles_post_ra>
